<compile_context>
chip_gen: v6e
topology: v6e:2x2x1
jax: 0.10.0
libtpu: 0.0.40
codegen_flags: <defaults>
</compile_context>

<pallas_src>
import functools

import jax
import jax.numpy as jnp
import numpy as np
from jax.experimental import pallas as pl
from jax.experimental.pallas import tpu as pltpu


def _round_up(x, m):
    return (x + m - 1) // m * m


def dynamics_kernel(zu_ref, w1_ref, w2_ref, wh_ref, out_ref, *, hidden,
                    logstd_start, logstd_end):
    """3 MXU passes + fused epilogue on one [TM, PACKED] batch tile."""
    cdt = w1_ref.dtype                      # compute dtype (f32 or bf16)
    x = zu_ref[...].astype(cdt)             # [TM, z+u+1]

    def masked_relu(a):
        # ReLU only on the true hidden columns; the ones column and the
        # z_t passthrough columns (col >= hidden) must not be clipped.
        col = jax.lax.broadcasted_iota(jnp.int32, a.shape, 1)
        return jnp.where(col < hidden, jnp.maximum(a, 0.0), a)

    h = masked_relu(jnp.dot(x, w1_ref[...], preferred_element_type=jnp.float32))
    h = masked_relu(jnp.dot(h.astype(cdt), w2_ref[...],
                            preferred_element_type=jnp.float32))
    y = jnp.dot(h.astype(cdt), wh_ref[...], preferred_element_type=jnp.float32)

    # Fused epilogue: exp() on the logstd columns only (EUP slot).  Mask the
    # exp *input* so large-magnitude A/B columns cannot generate inf lanes.
    col = jax.lax.broadcasted_iota(jnp.int32, y.shape, 1)
    is_logstd = (col >= logstd_start) & (col < logstd_end)
    y = jnp.where(is_logstd, jnp.exp(jnp.where(is_logstd, y, 0.0)), y)

    out_ref[...] = y.astype(out_ref.dtype)


def pack_params(params, *, z_dim, u_dim, hidden, dtype=jnp.float32):
    """Fold biases + residual + the 4 heads into 3 packed weight matrices.

    Augmented layout:
      input   : [z | u | 1]                              width z+u+1
      hidden  : [h (H cols) | 1 | z_t passthrough]       width H+1+z
      output  : [A | B | mean | logstd | zero-pad]       width round_up(.,128)
    """
    z, u, H = z_dim, u_dim, hidden
    a_cols, b_cols = z * z, z * u
    head = a_cols + b_cols + 2 * z
    packed_w = _round_up(head, 128)
    aug_in = z + u + 1
    aug_h = H + 1 + z
    mean_start = a_cols + b_cols

    P = {k: np.asarray(v, np.float32) for k, v in params.items()}

    w1 = np.zeros((aug_in, aug_h), np.float32)
    w1[:z + u, :H] = P["w1"]
    w1[z + u, :H] = P["b1"][0]              # bias row (input ones column)
    w1[z + u, H] = 1.0                      # regenerate the ones column
    w1[:z, H + 1:] = np.eye(z)              # pass z_t through for the residual

    w2 = np.zeros((aug_h, aug_h), np.float32)
    w2[:H, :H] = P["w2"]
    w2[H, :H] = P["b2"][0]
    w2[H, H] = 1.0
    w2[H + 1:, H + 1:] = np.eye(z)

    # Head order [A | B | mean | logstd]: A/B slices become 128-lane aligned.
    wh = np.zeros((aug_h, packed_w), np.float32)
    wh[:H, :head] = np.concatenate([P["wa"], P["wb"], P["wm"], P["wl"]], axis=1)
    wh[H, :head] = np.concatenate([P["ba"], P["bb"], P["bm"], P["bl"]], axis=1)[0]
    wh[H + 1:, mean_start:mean_start + z] = np.eye(z)   # mean += z_t

    return dict(w1=jnp.asarray(w1, dtype),
                w2=jnp.asarray(w2, dtype),
                wh=jnp.asarray(wh, dtype))


def dynamics_forward(z_t, u_t, packed, *, z_dim, u_dim, hidden, block_m=512):
    """Returns (mean, scale_diag, A, B)."""
    batch = z_t.shape[0]
    a_cols, b_cols = z_dim * z_dim, z_dim * u_dim
    mean_start = a_cols + b_cols
    logstd_start = mean_start + z_dim
    logstd_end = logstd_start + z_dim
    aug_in = z_dim + u_dim + 1
    aug_h = hidden + 1 + z_dim
    packed_w = packed["wh"].shape[1]

    # Single concat in the wrapper: [z | u | 1]; the ones column carries every
    # bias (and the residual) through the matmuls.
    ones = jnp.ones((batch, 1), jnp.float32)
    zu = jnp.concatenate([z_t.astype(jnp.float32),
                          u_t.astype(jnp.float32), ones], axis=-1)

    tm = min(block_m, _round_up(batch, 8))
    padded = _round_up(batch, tm)
    if padded != batch:
        zu = jnp.pad(zu, ((0, padded - batch), (0, 0)))

    kernel = functools.partial(dynamics_kernel, hidden=hidden,
                               logstd_start=logstd_start,
                               logstd_end=logstd_end)

    out = pl.pallas_call(
        kernel,
        out_shape=jax.ShapeDtypeStruct((padded, packed_w), jnp.float32),
        grid=(padded // tm,),
        in_specs=[
            pl.BlockSpec((tm, aug_in), lambda i: (i, 0)),
            # Weights: constant block index -> DMA'd once, VMEM-resident
            # across all grid steps.
            pl.BlockSpec((aug_in, aug_h), lambda i: (0, 0)),
            pl.BlockSpec((aug_h, aug_h), lambda i: (0, 0)),
            pl.BlockSpec((aug_h, packed_w), lambda i: (0, 0)),
        ],
        out_specs=pl.BlockSpec((tm, packed_w), lambda i: (i, 0)),
        compiler_params=pltpu.CompilerParams(
            dimension_semantics=("parallel",)),
    )(zu, packed["w1"], packed["w2"], packed["wh"])

    out = out[:batch]
    # A (0:256) and B (256:384) are 128-lane aligned slices.
    A = out[:, :a_cols]
    B = out[:, a_cols:mean_start]
    mean = out[:, mean_start:logstd_start]
    scale = out[:, logstd_start:logstd_end]
    return mean, scale, A, B


def dynamics_reference(z_t, u_t, params):
    zu = jnp.concatenate([z_t, u_t], axis=-1)
    h = jnp.maximum(zu @ params["w1"] + params["b1"], 0.0)
    h = jnp.maximum(h @ params["w2"] + params["b2"], 0.0)
    mean = h @ params["wm"] + params["bm"] + z_t
    scale = jnp.exp(h @ params["wl"] + params["bl"])
    A = h @ params["wa"] + params["ba"]
    B = h @ params["wb"] + params["bb"]
    return mean, scale, A, B


def init_params(key, z_dim, u_dim, hidden):
    ks = jax.random.split(key, 12)

    def lin(kw, kb, fan_in, fan_out):
        bound = 1.0 / np.sqrt(fan_in)
        w = jax.random.uniform(kw, (fan_in, fan_out), jnp.float32, -bound, bound)
        b = jax.random.uniform(kb, (1, fan_out), jnp.float32, -bound, bound)
        return w, b

    w1, b1 = lin(ks[0], ks[1], z_dim + u_dim, hidden)
    w2, b2 = lin(ks[2], ks[3], hidden, hidden)
    wm, bm = lin(ks[4], ks[5], hidden, z_dim)
    wl, bl = lin(ks[6], ks[7], hidden, z_dim)
    wa, ba = lin(ks[8], ks[9], hidden, z_dim * z_dim)
    wb, bb = lin(ks[10], ks[11], hidden, z_dim * u_dim)

    return dict(w1=w1, b1=b1, w2=w2, b2=b2,
                wm=wm, bm=bm, wl=wl, bl=bl,
                wa=wa, ba=ba, wb=wb, bb=bb)


if __name__ == "__main__":
    batch, z_dim, u_dim, hidden = 128, 16, 8, 32

    key = jax.random.PRNGKey(0)
    kp, kz, ku = jax.random.split(key, 3)
    params = init_params(kp, z_dim, u_dim, hidden)
    packed = pack_params(params, z_dim=z_dim, u_dim=u_dim, hidden=hidden,
                         dtype=jnp.float32)

    z_t = jax.random.normal(kz, (batch, z_dim), jnp.float32)
    u_t = jax.random.normal(ku, (batch, u_dim), jnp.float32)

    # block_m=64 so the demo exercises grid=(2,) with weights DMA'd once;
    # in production use the default block_m=512 with a large batch.
    fwd = jax.jit(functools.partial(dynamics_forward, z_dim=z_dim, u_dim=u_dim,
                                    hidden=hidden, block_m=64))
    mean, scale, A, B = jax.block_until_ready(fwd(z_t, u_t, packed))

    mean_r, scale_r, A_r, B_r = dynamics_reference(z_t, u_t, params)
    assert np.allclose(np.asarray(mean), np.asarray(mean_r), atol=2e-5)
    assert np.allclose(np.asarray(scale), np.asarray(scale_r), atol=2e-5)
    assert np.allclose(np.asarray(A), np.asarray(A_r), atol=2e-5)
    assert np.allclose(np.asarray(B), np.asarray(B_r), atol=2e-5)

    print("KERNEL_OK")
</pallas_src>

<mosaic_0001>
module attributes {stable_mosaic.version = 11 : i64} {
  func.func @dynamics_kernel(%arg0: i32, %arg1: memref<64x25xf32, #tpu.memory_space<vmem>>, %arg2: memref<25x49xf32, #tpu.memory_space<vmem>>, %arg3: memref<49x49xf32, #tpu.memory_space<vmem>>, %arg4: memref<49x512xf32, #tpu.memory_space<vmem>>, %arg5: memref<64x512xf32, #tpu.memory_space<vmem>>) attributes {dimension_semantics = [#tpu.dimension_semantics<parallel>], iteration_bounds = array<i64: 2>, scalar_prefetch = 0 : i64, scratch_operands = 0 : i64, tpu.core_type = #tpu.core_type<tc>, window_params = [{transform_indices = @transform_0, window_bounds = array<i64: 64, 25>}, {pipeline_mode = #tpu.pipeline_mode<synchronous>, transform_indices = @transform_1, window_bounds = array<i64: 25, 49>}, {pipeline_mode = #tpu.pipeline_mode<synchronous>, transform_indices = @transform_2, window_bounds = array<i64: 49, 49>}, {pipeline_mode = #tpu.pipeline_mode<synchronous>, transform_indices = @transform_3, window_bounds = array<i64: 49, 512>}, {transform_indices = @transform_4, window_bounds = array<i64: 64, 512>}]} {
    %c0 = arith.constant 0 : index
    %c0_0 = arith.constant 0 : index
    %0 = vector.load %arg1[%c0, %c0_0] : memref<64x25xf32, #tpu.memory_space<vmem>>, vector<64x25xf32>
    %c0_1 = arith.constant 0 : index
    %c0_2 = arith.constant 0 : index
    %1 = vector.load %arg2[%c0_1, %c0_2] : memref<25x49xf32, #tpu.memory_space<vmem>>, vector<25x49xf32>
    %cst = arith.constant dense<0.000000e+00> : vector<64x49xf32>
    %2 = tpu.matmul %0, %1, %cst {dimension_numbers = #tpu.dot_dimension_numbers<[1], [0], [0], [1], [0, 0, 1, 1], [], []>} : vector<64x25xf32>, vector<25x49xf32>, vector<64x49xf32> -> vector<64x49xf32>
    %3 = tpu.iota {dimensions = array<i32: 1>} : vector<64x49xi32>
    %c32_i32 = arith.constant 32 : i32
    %4 = vector.broadcast %c32_i32 : i32 to vector<64x49xi32>
    %5 = arith.cmpi slt, %3, %4 : vector<64x49xi32>
    %cst_3 = arith.constant 0.000000e+00 : f32
    %6 = vector.broadcast %cst_3 : f32 to vector<64x49xf32>
    %7 = arith.maximumf %2, %6 : vector<64x49xf32>
    %8 = arith.select %5, %7, %2 : vector<64x49xi1>, vector<64x49xf32>
    %c0_4 = arith.constant 0 : index
    %c0_5 = arith.constant 0 : index
    %9 = vector.load %arg3[%c0_4, %c0_5] : memref<49x49xf32, #tpu.memory_space<vmem>>, vector<49x49xf32>
    %cst_6 = arith.constant dense<0.000000e+00> : vector<64x49xf32>
    %10 = tpu.matmul %8, %9, %cst_6 {dimension_numbers = #tpu.dot_dimension_numbers<[1], [0], [0], [1], [0, 0, 1, 1], [], []>} : vector<64x49xf32>, vector<49x49xf32>, vector<64x49xf32> -> vector<64x49xf32>
    %11 = tpu.iota {dimensions = array<i32: 1>} : vector<64x49xi32>
    %c32_i32_7 = arith.constant 32 : i32
    %12 = vector.broadcast %c32_i32_7 : i32 to vector<64x49xi32>
    %13 = arith.cmpi slt, %11, %12 : vector<64x49xi32>
    %cst_8 = arith.constant 0.000000e+00 : f32
    %14 = vector.broadcast %cst_8 : f32 to vector<64x49xf32>
    %15 = arith.maximumf %10, %14 : vector<64x49xf32>
    %16 = arith.select %13, %15, %10 : vector<64x49xi1>, vector<64x49xf32>
    %c0_9 = arith.constant 0 : index
    %c0_10 = arith.constant 0 : index
    %17 = vector.load %arg4[%c0_9, %c0_10] : memref<49x512xf32, #tpu.memory_space<vmem>>, vector<49x512xf32>
    %cst_11 = arith.constant dense<0.000000e+00> : vector<64x512xf32>
    %18 = tpu.matmul %16, %17, %cst_11 {dimension_numbers = #tpu.dot_dimension_numbers<[1], [0], [0], [1], [0, 0, 1, 1], [], []>} : vector<64x49xf32>, vector<49x512xf32>, vector<64x512xf32> -> vector<64x512xf32>
    %19 = tpu.iota {dimensions = array<i32: 1>} : vector<64x512xi32>
    %c400_i32 = arith.constant 400 : i32
    %20 = vector.broadcast %c400_i32 : i32 to vector<64x512xi32>
    %21 = arith.cmpi sge, %19, %20 : vector<64x512xi32>
    %c416_i32 = arith.constant 416 : i32
    %22 = vector.broadcast %c416_i32 : i32 to vector<64x512xi32>
    %23 = arith.cmpi slt, %19, %22 : vector<64x512xi32>
    %24 = arith.andi %21, %23 : vector<64x512xi1>
    %cst_12 = arith.constant 0.000000e+00 : f32
    %25 = vector.broadcast %cst_12 : f32 to vector<64x512xf32>
    %26 = arith.select %24, %18, %25 : vector<64x512xi1>, vector<64x512xf32>
    %27 = math.exp %26 : vector<64x512xf32>
    %28 = arith.select %24, %27, %18 : vector<64x512xi1>, vector<64x512xf32>
    %c0_13 = arith.constant 0 : index
    %c0_14 = arith.constant 0 : index
    %29 = vector.load %arg5[%c0_13, %c0_14] : memref<64x512xf32, #tpu.memory_space<vmem>>, vector<64x512xf32>
    tpu.vector_store %arg5[%c0_13, %c0_14], %28 {strides = array<i32>} : memref<64x512xf32, #tpu.memory_space<vmem>>, vector<64x512xf32>,
    return
  }
  func.func @transform_0(%arg0: i32) -> (i32, i32) {
    %c0_i32 = arith.constant 0 : i32
    %c0_i32_0 = arith.constant 0 : i32
    return %arg0, %c0_i32 : i32, i32
  }
  func.func @transform_1(%arg0: i32) -> (i32, i32) {
    %c0_i32 = arith.constant 0 : i32
    %c0_i32_0 = arith.constant 0 : i32
    %c0_i32_1 = arith.constant 0 : i32
    return %c0_i32, %c0_i32_0 : i32, i32
  }
  func.func @transform_2(%arg0: i32) -> (i32, i32) {
    %c0_i32 = arith.constant 0 : i32
    %c0_i32_0 = arith.constant 0 : i32
    %c0_i32_1 = arith.constant 0 : i32
    return %c0_i32, %c0_i32_0 : i32, i32
  }
  func.func @transform_3(%arg0: i32) -> (i32, i32) {
    %c0_i32 = arith.constant 0 : i32
    %c0_i32_0 = arith.constant 0 : i32
    %c0_i32_1 = arith.constant 0 : i32
    return %c0_i32, %c0_i32_0 : i32, i32
  }
  func.func @transform_4(%arg0: i32) -> (i32, i32) {
    %c0_i32 = arith.constant 0 : i32
    %c0_i32_0 = arith.constant 0 : i32
    return %arg0, %c0_i32 : i32, i32
  }
}

</mosaic_0001>

<bundles_post_ra>
// kernel: dynamics_forward.1
= control target key start
LH: loop header
LB: loop body
LE: loop exit
PB: predicated region body
PF: predicated region fallthrough
CT: control target
= control target key end

     0   :  { %9 = vsyncpa [#allocation3], 0  ;;  %s1305_s15 = smov 0   ;;  %s1536_s0 = inlined_call_operand.vmem [shape: f32[128,25], index: 0, kind: input, shape index: {}]   ;;  %s1537_s1 = inlined_call_operand.vmem [shape: f32[25,49], index: 1, kind: input, shape index: {}]   ;;  %s1538_s2 = inlined_call_operand.vmem [shape: f32[49,49], index: 2, kind: input, shape index: {}]   ;;  %s1539_s3 = inlined_call_operand.hbm [shape: f32[49,512], index: 3, kind: input, shape index: {}]   ;;  %s1540_s4 = inlined_call_operand.vmem [shape: f32[128,512], index: 4, kind: output, shape index: {}]  }
   0x1 LB: > { %s1074_s16 = sadd.s32 4294967295, %s1274_s15   ;;  %p1076_p0 = scmp.ge.s32.totalorder %s1274_s15, 1  ;;  %s1274_s15 = sphi %s1305_s15, %s15_s15  }
   0x2   : > { %p135_p1 = scmp.lt.s32.totalorder %s1274_s15, 3  ;;  %s1276_s17 = smov [#allocation2]  }
   0x3   : > { %s153_s18 = sshll.u32 %s1276_s17, 4  ;;  %p1317_p3 = scmp.eq.s32.totalorder %s1074_s16, 0  ;;  %s154_s18 = int_to_ptr.vmem [resolvable:$true] %s153_s18 }
   0x4   : > { %p1313_p2 = pnand %p1076_p0, %p135_p1  ;;  %s1249_s21 = scalar_lea.vmem %s154_s18, 3584 }
   0x5   : > { %p1250_p7 = scmp.ne.s32.totalorder %s154_s18, %s1249_s21  ;;  %p1257_p10 = scmp.lt.s32.totalorder %s154_s18, %s154_s18 }
   0x6   : > { %p1204_p4 = pneg %p1313_p2  ;;  %p1258_p11 = scmp.lt.s32.totalorder %s1249_s21, %s1249_s21 }
   0x8   : > { %p1205_p5 = pnand %p1317_p3, %p1204_p4  ;;  %p1259_p12 = por %p1258_p11, %p1257_p10 }
   0xa   : > { %p1240_p6 = pneg %p1205_p5 }
   0xc   : > { %p1252_p8 = pnand %p1250_p7, %p1240_p6 }
   0xe   : > { %p1253_p9 = pneg %p1252_p8 }
  0x10   : > { %p1260_p13 = pnand %p1259_p12, %p1253_p9 }
  0x12   : > { %1263 = shalt.err (!%p1260_p13)
}
  0x13   : > { %s1277_s22 = smov 512   ;;  %s1278_s23 = smov 32  }
  0x14   : > { %1207 = dma.hbm_to_vmem [thread:$0]  (!%p1205_p5), %s1539_s3, 3584, %s154_s18, [#allocation3], %s1277_s22, %s1277_s22, %s1278_s23  }
  0x15   : > { %178 = sbr.rel (%p1313_p2) target bundleno = 676 (0x2a4), region = 36 }
  0x1a   : > { %1269 = dma.done.wait (%p1317_p3), [#allocation3], 3584  }
  0x1b   : > { %1271 = vsyncadd (%p1317_p3), [#allocation3], 4294963712  ;;  %s1081_s26 = sshll.u32 %s1074_s16, 3  ;;  %vm255_vm0 = vcmask 1040384   ;;  %vm230_vm1 = vcmask 203776   ;;  %v228_v1 = vld [vmem:[%s1537_s1 + $0x10] sm:$0xff]  ;;  %v364_v28 = vlaneseq }
  0x1c   : > { %p206_p0 = scmp.lt.s32.totalorder %s1081_s26, 15  ;;  %v229_v0 = vld [vmem:[%s1537_s1 + $0x18] sm:$0x1]  ;;  %v227_v3 = vld [vmem:[%s1537_s1 + $0x8] sm:$0xff]  ;;  %v226_v4 = vld [vmem:[%s1537_s1] sm:$0xff]  ;;  %vm390_vm3 = vcmask 400384  }
  0x1d   : > { %1154 = vmatprep.subr.msk.mxu0 %vm255_vm0, %v229_v0  ;;  %v389_v5 = vld [vmem:[%s1538_s2 + $0x30] sm:$0x1]  ;;  %v388_v6 = vld [vmem:[%s1538_s2 + $0x28] sm:$0xff]  ;;  %v387_v8 = vld [vmem:[%s1538_s2 + $0x20] sm:$0xff]  ;;  %v1398_v29 = vand.u32 127, %v364_v28 }
  0x1e   : > { %s1546_s26 = smov (!%p206_p0, %s1081_s26), 15  ;;  %1155 = vmatpush3.msk.msra.mxu0 %vm255_vm0, %v229_v0  ;;  %1174 = vmatprep.subr.msk.mxu1 %vm255_vm0, %v389_v5  ;;  %v386_v10 = vld [vmem:[%s1538_s2 + $0x18] sm:$0xff]  ;;  %v385_v16 = vld [vmem:[%s1538_s2 + $0x10] sm:$0xff]  ;;  %v384_v17 = vld [vmem:[%s1538_s2 + $0x8] sm:$0xff] }
  0x1f   : > { %s1082_s27 = sshll.u32 %s1546_s26, 3  ;;  %1156 = vmatprep.subr.mxu0 %v228_v1  ;;  %1175 = vmatpush3.msk.msra.mxu1 %vm255_vm0, %v389_v5  ;;  %v383_v18 = vld [vmem:[%s1538_s2] sm:$0xff]  ;;  %v566_v19 = vld [vmem:[#allocation2 + $0xd8] sm:$0x1]  ;;  %v564_v20 = vld [vmem:[#allocation2 + $0xc8] sm:$0x1] }
  0x20   : > { %s1340_s30 = scalar_lea.vmem %s1536_s0, %s1082_s27  ;;  %1157 = vmatpush3.msra.mxu0 %v228_v1  ;;  %1176 = vmatprep.subr.mxu1 %v388_v6  ;;  %v563_v21 = vld [vmem:[#allocation2 + $0xc0] sm:$0x1]  ;;  %v560_v22 = vld [vmem:[#allocation2 + $0xa8] sm:$0xff]  ;;  %vm366_vm2 = vcmp.lt.s32.totalorder %v1398_v29, 32  ;;  %v565_v37 = vld [vmem:[#allocation2 + $0xd0] sm:$0x1] }
  0x21   : > { %v218_v2 = vld [vmem:[%s1340_s30] sm:$0xff]  ;;  %1158 = vmatprep.subr.mxu0 %v227_v3  ;;  %v219_v7 = vld [vmem:[%s1340_s30 + $0x8] sm:$0xff]  ;;  %v220_v9 = vld [vmem:[%s1340_s30 + $0x10] sm:$0xff]  ;;  %1177 = vmatpush3.msra.mxu1 %v388_v6  ;;  %s1126_s29 = sshll.u32 %s1546_s26, 5 }
  0x22   : > { %1162 = vmatprep.mubr.msk.f32.mxu0 %vm230_vm1, %v218_v2  ;;  %1159 = vmatpush3.msra.mxu0 %v227_v3  ;;  %v221_v11 = vld [vmem:[%s1340_s30 + $0x18] sm:$0xff]  ;;  %v222_v12 = vld [vmem:[%s1340_s30 + $0x20] sm:$0xff]  ;;  %v223_v13 = vld [vmem:[%s1340_s30 + $0x28] sm:$0xff]  ;;  %s1463_s6 = scalar_lea.vmem %s1540_s4, %s1126_s29 }
  0x23   : > { %1160 = vmatprep.subr.mxu0 %v226_v4  ;;  %1178 = vmatprep.subr.mxu1 %v387_v8  ;;  %v224_v14 = vld [vmem:[%s1340_s30 + $0x30] sm:$0xff]  ;;  %v225_v15 = vld [vmem:[%s1340_s30 + $0x38] sm:$0xff]  ;;  %v559_v23 = vld [vmem:[#allocation2 + $0xa0] sm:$0xff] }
  0x24   : > { %1161 = vmatpush3.msra.mxu0 %v226_v4  ;;  %1179 = vmatpush3.msra.mxu1 %v387_v8  ;;  %v556_v24 = vld [vmem:[#allocation2 + $0x88] sm:$0xff]  ;;  %v555_v25 = vld [vmem:[#allocation2 + $0x80] sm:$0xff]  ;;  %v562_v40 = vld [vmem:[#allocation2 + $0xb8] sm:$0xff] }
  0x25   : > { %1163 = vmatmul.mubr.msk.f32.vlgmr.msra.gmra.mxu0 %vm230_vm1, %v219_v7  ;;  %1180 = vmatprep.subr.mxu1 %v386_v10  ;;  %v552_v26 = vld [vmem:[#allocation2 + $0x68] sm:$0xff]  ;;  %v551_v27 = vld [vmem:[#allocation2 + $0x60] sm:$0xff]  ;;  %v561_v42 = vld [vmem:[#allocation2 + $0xb0] sm:$0xff] }
  0x26   : > { %1165 = vmatprep.mubr.msk.f32.mxu0 %vm230_vm1, %v220_v9  ;;  %1181 = vmatpush3.msra.mxu1 %v386_v10  ;;  %v558_v45 = vld [vmem:[#allocation2 + $0x98] sm:$0xff]  ;;  %v557_v48 = vld [vmem:[#allocation2 + $0x90] sm:$0xff]  ;;  %v548_v62 = vld [vmem:[#allocation2 + $0x48] sm:$0xff]  ;;  %v1279_v9 = vmov 0.0  }
  0x27   : > { %1182 = vmatprep.subr.mxu1 %v385_v16  ;;  %1104 = vmatprep.subr.msk.mxu0 %vm255_vm0, %v564_v20  ;;  %v554_v50 = vld [vmem:[#allocation2 + $0x78] sm:$0xff]  ;;  %v553_v52 = vld [vmem:[#allocation2 + $0x70] sm:$0xff]  ;;  %v547_v0 = vld [vmem:[#allocation2 + $0x40] sm:$0xff] }
  0x28   : > { %1183 = vmatpush3.msra.mxu1 %v385_v16  ;;  %1105 = vmatpush1.msk.msra.mxu0 %vm255_vm0, %v563_v21  ;;  %v550_v55 = vld [vmem:[#allocation2 + $0x58] sm:$0xff]  ;;  %v549_v63 = vld [vmem:[#allocation2 + $0x50] sm:$0xff]  ;;  %v544_v2 = vld [vmem:[#allocation2 + $0x28] sm:$0xff] }
  0x29   : > { %1166 = vmatmul.mubr.msk.f32.gmra.mxu0 %vm230_vm1, %v221_v11  ;;  %1184 = vmatprep.subr.mxu1 %v384_v17  ;;  %v546_v1 = vld [vmem:[#allocation2 + $0x38] sm:$0xff]  ;;  %v545_v3 = vld [vmem:[#allocation2 + $0x30] sm:$0xff]  ;;  %v543_v4 = vld [vmem:[#allocation2 + $0x20] sm:$0xff] }
  0x2a   : > { %1168 = vmatprep.mubr.msk.f32.mxu0 %vm230_vm1, %v222_v12  ;;  %1185 = vmatpush3.msra.mxu1 %v384_v17  ;;  %v542_v5 = vld [vmem:[#allocation2 + $0x18] sm:$0xff]  ;;  %v540_v6 = vld [vmem:[#allocation2 + $0x8] sm:$0xff]  ;;  %v541_v7 = vld [vmem:[#allocation2 + $0x10] sm:$0xff] }
  0x2b   : > { %1186 = vmatprep.subr.mxu1 %v383_v18  ;;  %623 = vmatprep.subr.mxu0 %v560_v22  ;;  %v539_v8 = vld [vmem:[#allocation2] sm:$0xff] }
  0x2c   : > { %1187 = vmatpush3.msra.mxu1 %v383_v18  ;;  %624 = vmatpush1.msra.mxu0 %v559_v23 }
  0x2d   : > { %1169 = vmatmul.mubr.msk.f32.gmra.mxu0 %vm230_vm1, %v223_v13  ;;  %1114 = vmatprep.subr.msk.mxu1 %vm255_vm0, %v566_v19 }
  0x2e   : > { %1171 = vmatprep.mubr.msk.f32.mxu0 %vm230_vm1, %v224_v14  ;;  %625 = vmatprep.subr.mxu0 %v556_v24 }
  0x2f   : > { %626 = vmatpush1.msra.mxu0 %v555_v25 }
  0x30   : > { %627 = vmatprep.subr.mxu0 %v552_v26 }
  0x31   : > { %1172 = vmatmul.mubr.msk.f32.gmra.mxu0 %vm230_vm1, %v225_v15 }
  0x32   : > { %628 = vmatpush1.msra.mxu0 %v551_v27  ;;  %667 = vmatprep.mubr.f32.mxu0 %v1279_v9 }
  0x33   : > { %629 = vmatprep.subr.mxu0 %v548_v62 }
  0x34   : > { %630 = vmatpush1.msra.mxu0 %v547_v0 }
  0x35   : > { %631 = vmatprep.subr.mxu0 %v544_v2 }
  0x36   : > { %632 = vmatpush1.msra.mxu0 %v543_v4 }
  0x37   : > { %633 = vmatprep.subr.mxu0 %v540_v6 }
  0x38   : > { %634 = vmatpush1.msra.mxu0 %v539_v8 }
  0xe5   : > { %v1164_v30 = vpop.f32.mrf.mxu0 }
  0xe6   : > { %v368_v31 = vmax.f32 %v1164_v30, 0.0 }
  0xe7   : > { %v325_v32 = vpop.f32.mrf.mxu0 }
  0xe8   : > { %v367_v33 = vmax.f32 %v325_v32, 0.0  ;;  %v376_v38 = vsel %vm366_vm2, %v368_v31, %v1164_v30 }
  0xe9   : > { %v1167_v34 = vpop.f32.mrf.mxu0 }
  0xea   : > { %v370_v35 = vmax.f32 %v1167_v34, 0.0  ;;  %v375_v36 = vsel %vm366_vm2, %v367_v33, %v325_v32 }
  0xeb   : > { %v335_v39 = vpop.f32.mrf.mxu0  ;;  %1188 = vmatprep.mubr.msk.f32.mxu1 %vm390_vm3, %v375_v36 }
  0xec   : > { %v369_v41 = vmax.f32 %v335_v39, 0.0  ;;  %1189 = vmatmul.mubr.msk.f32.vlgmr.msra.gmra.mxu1 %vm390_vm3, %v376_v38  ;;  %v378_v43 = vsel %vm366_vm2, %v370_v35, %v1167_v34  ;;  %v831_v35 = vadd.s32 384, %v1398_v29 }
  0xed   : > { %v1170_v44 = vpop.f32.mrf.mxu0  ;;  %1115 = vmatpush1.msk.msra.mxu1 %vm255_vm0, %v565_v37 }
  0xee   : > { %v377_v46 = vsel %vm366_vm2, %v369_v41, %v335_v39  ;;  %v372_v47 = vmax.f32 %v1170_v44, 0.0  ;;  %736 = vmatprep.subr.mxu1 %v562_v40  ;;  %vm835_vm4 = vcmp.ge.s32.totalorder %v831_v35, 400  ;;  %vm839_vm5 = vcmp.lt.s32.totalorder %v831_v35, 416 }
  0xef   : > { %v345_v49 = vpop.f32.mrf.mxu0  ;;  %1191 = vmatprep.mubr.msk.f32.mxu1 %vm390_vm3, %v377_v46  ;;  %737 = vmatpush1.msra.mxu1 %v561_v42  ;;  %vm1465_vm6 = vmand %vm835_vm4, %vm839_vm5 }
  0xf0   : > { %v371_v51 = vmax.f32 %v345_v49, 0.0  ;;  %1192 = vmatmul.mubr.msk.f32.gmra.mxu1 %vm390_vm3, %v378_v43  ;;  %738 = vmatprep.subr.mxu1 %v558_v45  ;;  %v380_v53 = vsel %vm366_vm2, %v372_v47, %v1170_v44 }
  0xf1   : > { %v1173_v54 = vpop.f32.mrf.mxu0  ;;  %739 = vmatpush1.msra.mxu1 %v557_v48 }
  0xf2   : > { %v379_v56 = vsel %vm366_vm2, %v371_v51, %v345_v49  ;;  %v374_v57 = vmax.f32 %v1173_v54, 0.0  ;;  %740 = vmatprep.subr.mxu1 %v554_v50 }
  0xf3   : > { %1194 = vmatprep.mubr.msk.f32.mxu1 %vm390_vm3, %v379_v56  ;;  %v355_v58 = vpop.f32.mrf.mxu0  ;;  %741 = vmatpush1.msra.mxu1 %v553_v52 }
  0xf4   : > { %1195 = vmatmul.mubr.msk.f32.gmra.mxu1 %vm390_vm3, %v380_v53  ;;  %v373_v59 = vmax.f32 %v355_v58, 0.0  ;;  %742 = vmatprep.subr.mxu1 %v550_v55  ;;  %v382_v60 = vsel %vm366_vm2, %v374_v57, %v1173_v54 }
  0xf5   : > { %743 = vmatpush1.msra.mxu1 %v549_v63 }
  0xf6   : > { %v381_v61 = vsel %vm366_vm2, %v373_v59, %v355_v58  ;;  %744 = vmatprep.subr.mxu1 %v546_v1 }
  0xf7   : > { %1197 = vmatprep.mubr.msk.f32.mxu1 %vm390_vm3, %v381_v61  ;;  %745 = vmatpush1.msra.mxu1 %v545_v3 }
  0xf8   : > { %1198 = vmatmul.mubr.msk.f32.gmra.mxu1 %vm390_vm3, %v382_v60  ;;  %746 = vmatprep.subr.mxu1 %v542_v5 }
  0xf9   : > { %747 = vmatpush1.msra.mxu1 %v541_v7  ;;  %780 = vmatprep.mubr.f32.mxu1 %v1279_v9 }
 0x1ac   : > { %v1190_v10 = vpop.f32.mrf.mxu1 }
 0x1ad   : > { %v524_v14 = vmax.f32 %v1190_v10, 0.0 }
 0x1ae   : > { %v484_v11 = vpop.f32.mrf.mxu1 }
 0x1af   : > { %v523_v12 = vmax.f32 %v484_v11, 0.0  ;;  %v532_v17 = vsel %vm366_vm2, %v524_v14, %v1190_v10 }
 0x1b0   : > { %v1193_v13 = vpop.f32.mrf.mxu1 }
 0x1b1   : > { %v531_v15 = vsel %vm366_vm2, %v523_v12, %v484_v11  ;;  %v526_v20 = vmax.f32 %v1193_v13, 0.0 }
 0x1b2   : > { %v494_v16 = vpop.f32.mrf.mxu1  ;;  %1106 = vmatmul.mubr.msk.f32.vlgmr.msra.gmra.mxu0 %vm390_vm3, %v531_v15  ;;  %1116 = vmatmul.mubr.msk.f32.vlgmr.msra.gmra.mxu1 %vm390_vm3, %v531_v15 }
 0x1b3   : > { %673 = vmatprep.mubr.f32.mxu0 %v1279_v9  ;;  %786 = vmatprep.mubr.f32.mxu1 %v1279_v9  ;;  %v525_v18 = vmax.f32 %v494_v16, 0.0  ;;  %v534_v23 = vsel %vm366_vm2, %v526_v20, %v1193_v13 }
 0x1b4   : > { %v1196_v19 = vpop.f32.mrf.mxu1 }
 0x1b5   : > { %v533_v21 = vsel %vm366_vm2, %v525_v18, %v494_v16  ;;  %v528_v26 = vmax.f32 %v1196_v19, 0.0 }
 0x1b6   : > { %1107 = vmatmul.mubr.msk.f32.gmra.mxu0 %vm390_vm3, %v532_v17  ;;  %1117 = vmatmul.mubr.msk.f32.gmra.mxu1 %vm390_vm3, %v532_v17  ;;  %v504_v22 = vpop.f32.mrf.mxu1 }
 0x1b7   : > { %679 = vmatprep.mubr.f32.mxu0 %v1279_v9  ;;  %792 = vmatprep.mubr.f32.mxu1 %v1279_v9  ;;  %v527_v24 = vmax.f32 %v504_v22, 0.0  ;;  %v536_v30 = vsel %vm366_vm2, %v528_v26, %v1196_v19 }
 0x1b8   : > { %v1199_v25 = vpop.f32.mrf.mxu1 }
 0x1b9   : > { %v535_v27 = vsel %vm366_vm2, %v527_v24, %v504_v22  ;;  %v530_v32 = vmax.f32 %v1199_v25, 0.0 }
 0x1ba   : > { %1108 = vmatmul.mubr.msk.f32.gmra.mxu0 %vm390_vm3, %v533_v21  ;;  %1118 = vmatmul.mubr.msk.f32.gmra.mxu1 %vm390_vm3, %v533_v21  ;;  %v514_v28 = vpop.f32.mrf.mxu1 }
 0x1bb   : > { %685 = vmatprep.mubr.f32.mxu0 %v1279_v9  ;;  %798 = vmatprep.mubr.f32.mxu1 %v1279_v9  ;;  %v529_v31 = vmax.f32 %v514_v28, 0.0  ;;  %v538_v34 = vsel %vm366_vm2, %v530_v32, %v1199_v25 }
 0x1bd   : > { %v537_v33 = vsel %vm366_vm2, %v529_v31, %v514_v28 }
 0x1be   : > { %1109 = vmatmul.mubr.msk.f32.gmra.mxu0 %vm390_vm3, %v534_v23  ;;  %1119 = vmatmul.mubr.msk.f32.gmra.mxu1 %vm390_vm3, %v534_v23 }
 0x1bf   : > { %691 = vmatprep.mubr.f32.mxu0 %v1279_v9  ;;  %804 = vmatprep.mubr.f32.mxu1 %v1279_v9 }
 0x1c2   : > { %1110 = vmatmul.mubr.msk.f32.gmra.mxu0 %vm390_vm3, %v535_v27  ;;  %1120 = vmatmul.mubr.msk.f32.gmra.mxu1 %vm390_vm3, %v535_v27 }
 0x1c3   : > { %697 = vmatprep.mubr.f32.mxu0 %v1279_v9  ;;  %810 = vmatprep.mubr.f32.mxu1 %v1279_v9 }
 0x1c6   : > { %1111 = vmatmul.mubr.msk.f32.gmra.mxu0 %vm390_vm3, %v536_v30  ;;  %1121 = vmatmul.mubr.msk.f32.gmra.mxu1 %vm390_vm3, %v536_v30 }
 0x1c7   : > { %703 = vmatprep.mubr.f32.mxu0 %v1279_v9  ;;  %816 = vmatprep.mubr.f32.mxu1 %v1279_v9 }
 0x1ca   : > { %1112 = vmatmul.mubr.msk.f32.gmra.mxu0 %vm390_vm3, %v537_v33  ;;  %1122 = vmatmul.mubr.msk.f32.gmra.mxu1 %vm390_vm3, %v537_v33 }
 0x1cb   : > { %709 = vmatprep.mubr.f32.mxu0 %v1279_v9  ;;  %822 = vmatprep.mubr.f32.mxu1 %v1279_v9 }
 0x1ce   : > { %1113 = vmatmul.mubr.msk.f32.gmra.mxu0 %vm390_vm3, %v538_v34  ;;  %1123 = vmatmul.mubr.msk.f32.gmra.mxu1 %vm390_vm3, %v538_v34 }
 0x272   : > { %v669_v36 = vpop.f32.mrf.mxu0  ;;  %v782_v37 = vpop.f32.mrf.mxu1 }
 0x273   : > { %972 = vst [vmem:[%s1463_s6] sm:$0xff] %v669_v36  ;;  %974 = vst [vmem:[%s1463_s6 + $0x10] sm:$0xff] %v782_v37 }
 0x274   : > { %v671_v29 = vpop.f32.mrf.mxu0  ;;  %v784_v39 = vpop.f32.mrf.mxu1 }
 0x275   : > { %973 = vst [vmem:[%s1463_s6 + $0x8] sm:$0xff] %v671_v29  ;;  %v847_v40 = vsel %vm1465_vm6, %v784_v39, 0.0 }
 0x276   : > { %v882_v41 = vmul.f32 1.442695, %v847_v40  ;;  %v675_v42 = vpop.f32.mrf.mxu0  ;;  %v788_v43 = vpop.f32.mrf.mxu1 }
 0x277   : > { %976 = vst [vmem:[%s1463_s6 + $0x20] sm:$0xff] %v675_v42  ;;  %978 = vst [vmem:[%s1463_s6 + $0x30] sm:$0xff] %v788_v43 }
 0x278   : > { %1222 = vpow2.f32 %v882_v41  ;;  %v677_v44 = vpop.f32.mrf.mxu0  ;;  %v790_v45 = vpop.f32.mrf.mxu1 }
 0x279   : > { %977 = vst [vmem:[%s1463_s6 + $0x28] sm:$0xff] %v677_v44  ;;  %v851_v46 = vsel %vm1465_vm6, %v790_v45, 0.0 }
 0x27a   : > { %v890_v47 = vmul.f32 1.442695, %v851_v46  ;;  %v681_v48 = vpop.f32.mrf.mxu0  ;;  %v794_v49 = vpop.f32.mrf.mxu1 }
 0x27b   : > { %980 = vst [vmem:[%s1463_s6 + $0x40] sm:$0xff] %v681_v48  ;;  %982 = vst [vmem:[%s1463_s6 + $0x50] sm:$0xff] %v794_v49 }
 0x27c   : > { %1224 = vpow2.f32 %v890_v47  ;;  %v683_v50 = vpop.f32.mrf.mxu0  ;;  %v796_v51 = vpop.f32.mrf.mxu1 }
 0x27d   : > { %981 = vst [vmem:[%s1463_s6 + $0x48] sm:$0xff] %v683_v50  ;;  %v855_v52 = vsel %vm1465_vm6, %v796_v51, 0.0 }
 0x27e   : > { %v898_v53 = vmul.f32 1.442695, %v855_v52  ;;  %v687_v54 = vpop.f32.mrf.mxu0  ;;  %v800_v55 = vpop.f32.mrf.mxu1 }
 0x27f   : > { %984 = vst [vmem:[%s1463_s6 + $0x60] sm:$0xff] %v687_v54  ;;  %986 = vst [vmem:[%s1463_s6 + $0x70] sm:$0xff] %v800_v55 }
 0x280   : > { %1226 = vpow2.f32 %v898_v53  ;;  %v689_v56 = vpop.f32.mrf.mxu0  ;;  %v802_v57 = vpop.f32.mrf.mxu1 }
 0x281   : > { %985 = vst [vmem:[%s1463_s6 + $0x68] sm:$0xff] %v689_v56  ;;  %v859_v58 = vsel %vm1465_vm6, %v802_v57, 0.0 }
 0x282   : > { %v906_v59 = vmul.f32 1.442695, %v859_v58  ;;  %v693_v60 = vpop.f32.mrf.mxu0  ;;  %v806_v61 = vpop.f32.mrf.mxu1 }
 0x283   : > { %988 = vst [vmem:[%s1463_s6 + $0x80] sm:$0xff] %v693_v60  ;;  %990 = vst [vmem:[%s1463_s6 + $0x90] sm:$0xff] %v806_v61 }
 0x284   : > { %1228 = vpow2.f32 %v906_v59  ;;  %v695_v62 = vpop.f32.mrf.mxu0  ;;  %v808_v63 = vpop.f32.mrf.mxu1 }
 0x285   : > { %v1223_v0 = vpop.eup %1222  ;;  %989 = vst [vmem:[%s1463_s6 + $0x88] sm:$0xff] %v695_v62  ;;  %v863_v1 = vsel %vm1465_vm6, %v808_v63, 0.0 }
 0x286   : > { %v943_v2 = vsel %vm1465_vm6, %v1223_v0, %v784_v39  ;;  %v914_v3 = vmul.f32 1.442695, %v863_v1  ;;  %v699_v4 = vpop.f32.mrf.mxu0  ;;  %v812_v5 = vpop.f32.mrf.mxu1 }
 0x287   : > { %975 = vst [vmem:[%s1463_s6 + $0x18] sm:$0xff] %v943_v2  ;;  %992 = vst [vmem:[%s1463_s6 + $0xa0] sm:$0xff] %v699_v4 }
 0x288   : > { %994 = vst [vmem:[%s1463_s6 + $0xb0] sm:$0xff] %v812_v5  ;;  %1230 = vpow2.f32 %v914_v3  ;;  %v701_v6 = vpop.f32.mrf.mxu0  ;;  %v814_v7 = vpop.f32.mrf.mxu1 }
 0x289   : > { %v1225_v8 = vpop.eup %1224  ;;  %993 = vst [vmem:[%s1463_s6 + $0xa8] sm:$0xff] %v701_v6  ;;  %v867_v9 = vsel %vm1465_vm6, %v814_v7, 0.0 }
 0x28a   : > { %v947_v10 = vsel %vm1465_vm6, %v1225_v8, %v790_v45  ;;  %v922_v11 = vmul.f32 1.442695, %v867_v9  ;;  %v705_v12 = vpop.f32.mrf.mxu0  ;;  %v818_v13 = vpop.f32.mrf.mxu1 }
 0x28b   : > { %979 = vst [vmem:[%s1463_s6 + $0x38] sm:$0xff] %v947_v10  ;;  %996 = vst [vmem:[%s1463_s6 + $0xc0] sm:$0xff] %v705_v12 }
 0x28c   : > { %998 = vst [vmem:[%s1463_s6 + $0xd0] sm:$0xff] %v818_v13  ;;  %1232 = vpow2.f32 %v922_v11  ;;  %v707_v14 = vpop.f32.mrf.mxu0  ;;  %v820_v15 = vpop.f32.mrf.mxu1 }
 0x28d   : > { %v1227_v16 = vpop.eup %1226  ;;  %997 = vst [vmem:[%s1463_s6 + $0xc8] sm:$0xff] %v707_v14  ;;  %v871_v17 = vsel %vm1465_vm6, %v820_v15, 0.0 }
 0x28e   : > { %v951_v18 = vsel %vm1465_vm6, %v1227_v16, %v796_v51  ;;  %v930_v19 = vmul.f32 1.442695, %v871_v17  ;;  %v711_v20 = vpop.f32.mrf.mxu0  ;;  %v824_v21 = vpop.f32.mrf.mxu1 }
 0x28f   : > { %983 = vst [vmem:[%s1463_s6 + $0x58] sm:$0xff] %v951_v18  ;;  %1000 = vst [vmem:[%s1463_s6 + $0xe0] sm:$0xff] %v711_v20 }
 0x290   : > { %1002 = vst [vmem:[%s1463_s6 + $0xf0] sm:$0xff] %v824_v21  ;;  %1234 = vpow2.f32 %v930_v19  ;;  %v713_v22 = vpop.f32.mrf.mxu0  ;;  %v826_v23 = vpop.f32.mrf.mxu1 }
 0x291   : > { %v1229_v24 = vpop.eup %1228  ;;  %1001 = vst [vmem:[%s1463_s6 + $0xe8] sm:$0xff] %v713_v22  ;;  %v875_v25 = vsel %vm1465_vm6, %v826_v23, 0.0 }
 0x292   : > { %v955_v26 = vsel %vm1465_vm6, %v1229_v24, %v802_v57  ;;  %v938_v27 = vmul.f32 1.442695, %v875_v25 }
 0x293   : > { %987 = vst [vmem:[%s1463_s6 + $0x78] sm:$0xff] %v955_v26 }
 0x294   : > { %1236 = vpow2.f32 %v938_v27 }
 0x295   : > { %v1231_v28 = vpop.eup %1230 }
 0x296   : > { %v959_v30 = vsel %vm1465_vm6, %v1231_v28, %v808_v63 }
 0x297   : > { %991 = vst [vmem:[%s1463_s6 + $0x98] sm:$0xff] %v959_v30 }
 0x299   : > { %v1233_v31 = vpop.eup %1232 }
 0x29a   : > { %v963_v32 = vsel %vm1465_vm6, %v1233_v31, %v814_v7 }
 0x29b   : > { %995 = vst [vmem:[%s1463_s6 + $0xb8] sm:$0xff] %v963_v32 }
 0x29d   : > { %v1235_v33 = vpop.eup %1234 }
 0x29e   : > { %v967_v34 = vsel %vm1465_vm6, %v1235_v33, %v820_v15 }
 0x29f   : > { %999 = vst [vmem:[%s1463_s6 + $0xd8] sm:$0xff] %v967_v34 }
 0x2a1   : > { %v1237_v35 = vpop.eup %1236 }
 0x2a2   : > { %v971_v36 = vsel %vm1465_vm6, %v1237_v35, %v826_v23 }
 0x2a3   : > { %1003 = vst [vmem:[%s1463_s6 + $0xf8] sm:$0xff] %v971_v36 }
 0x2a4 PF: > { %s15_s15 = sadd.s32 1, %s1274_s15  }
 0x2a5   : > { %p12_p1 = scmp.ge.s32.totalorder %s15_s15, 4  }
 0x2a7   :  { %14 = sbr.rel (!%p12_p1) target bundleno = 1 (0x1), region = 71 }
 0x2ac   :  { %1028 = vsyncpa [#allocation3], 1 }
 0x2ad   :  { %1030 = vsyncpa [#allocation3 + $0x1], 1 }

</bundles_post_ra>
